<compile_context>
chip_gen: v5e
topology: v5e:2x2
jax: 0.10.0
libtpu: 0.0.40
codegen_flags: <defaults>
</compile_context>

<pallas_src>
import functools

import jax
import jax.numpy as jnp
from jax import lax
from jax.experimental import pallas as pl
from jax.experimental.pallas import tpu as pltpu


def _round_up(x, m):
    return (x + m - 1) // m * m


def _adapter_kernel(x_ref, w1_ref, b1_ref, w2_ref, b2_ref, g_ref, beta_ref,
                    o_ref, *, h_valid):
    x = x_ref[...]  # already f32; no unconditional cast

    # dense_1 + ReLU (MXU, f32 accumulate)
    h = jnp.dot(x, w1_ref[...], preferred_element_type=jnp.float32) + b1_ref[...]
    h = jnp.maximum(h, 0.0)

    # TODO(synk): nn.Dropout(0.3) is identity in eval mode; training-time dropout
    # would need pltpu.prng_seed / prng_random_bits and is omitted here.

    # dense_2
    y = jnp.dot(h, w2_ref[...], preferred_element_type=jnp.float32) + b2_ref[...]

    # LayerNorm over the valid hidden columns, eps = 1e-5.
    # Padded columns of y are exactly zero (zero-padded weights/biases), so a
    # single fused pass of sum(y) and sum(y*y) over the padded width gives the
    # correct statistics when divided by the *valid* width.
    inv_h = jnp.float32(1.0 / h_valid)
    s1 = jnp.sum(y, axis=-1, keepdims=True)
    s2 = jnp.sum(y * y, axis=-1, keepdims=True)
    mean = s1 * inv_h
    var = s2 * inv_h - mean * mean
    y_norm = (y - mean) * lax.rsqrt(var + 1e-5)

    o_ref[...] = (y_norm * g_ref[...] + beta_ref[...]).astype(o_ref.dtype)


def prepare_params(params):
    """One-time param prep: transpose PyTorch (out,in) weights to (in,out) and
    zero-pad the hidden dim up to a multiple of 128 (lane-dense)."""
    hidden = params["w1"].shape[0]
    h_pad = max(128, _round_up(hidden, 128))
    dh = h_pad - hidden

    def pad_mat(w):  # w: (H, H) already (in, out)
        return jnp.pad(w.astype(jnp.float32), ((0, dh), (0, dh)))

    def pad_vec(v):
        return jnp.pad(v.astype(jnp.float32), (0, dh)).reshape(1, h_pad)

    return {
        "hidden": hidden,
        "hidden_pad": h_pad,
        "w1": pad_mat(params["w1"].T),
        "b1": pad_vec(params["b1"]),
        "w2": pad_mat(params["w2"].T),
        "b2": pad_vec(params["b2"]),
        "gamma": pad_vec(params["gamma"]),
        "beta": pad_vec(params["beta"]),
    }


def description_adapter(x, prepared, *, tm_target=512):
    """x: [B, S, H] float32. prepared: output of prepare_params()."""
    B, S, H = x.shape
    assert H == prepared["hidden"]
    H_pad = prepared["hidden_pad"]

    M = B * S
    # Large lane-aligned row tile, but never bigger than the (8-aligned) problem.
    TM = min(tm_target, _round_up(M, 8))
    M_pad = _round_up(M, TM)
    grid_m = M_pad // TM

    x2d = x.reshape(M, H).astype(jnp.float32)
    x2d = jnp.pad(x2d, ((0, M_pad - M), (0, H_pad - H)))

    # VMEM budget (f32): 2 resident weight slabs + double-buffered in/out tiles
    # + intermediates, with headroom.
    bpe = 4
    est = (2 * 2 * H_pad * H_pad * bpe            # w1, w2 (double-buffer safe)
           + 2 * 4 * H_pad * bpe                  # b1, b2, gamma, beta
           + 2 * 2 * TM * H_pad * bpe             # x / out double-buffered
           + 2 * TM * H_pad * bpe                 # h, y intermediates
           + (4 << 20))
    vmem_limit = int(min(max(est, 32 << 20), 112 << 20))

    kernel = functools.partial(_adapter_kernel, h_valid=H)
    const = lambda i: (0, 0)

    out2d = pl.pallas_call(
        kernel,
        out_shape=jax.ShapeDtypeStruct((M_pad, H_pad), jnp.float32),
        grid_spec=pltpu.PrefetchScalarGridSpec(
            num_scalar_prefetch=0,
            grid=(grid_m,),
            in_specs=[
                pl.BlockSpec((TM, H_pad), lambda i: (i, 0)),   # x tile
                pl.BlockSpec((H_pad, H_pad), const),           # w1
                pl.BlockSpec((1, H_pad), const),               # b1
                pl.BlockSpec((H_pad, H_pad), const),           # w2
                pl.BlockSpec((1, H_pad), const),               # b2
                pl.BlockSpec((1, H_pad), const),               # gamma
                pl.BlockSpec((1, H_pad), const),               # beta
            ],
            out_specs=pl.BlockSpec((TM, H_pad), lambda i: (i, 0)),
        ),
        compiler_params=pltpu.CompilerParams(
            dimension_semantics=("parallel",),
            vmem_limit_bytes=vmem_limit,
        ),
    )(x2d, prepared["w1"], prepared["b1"], prepared["w2"], prepared["b2"],
      prepared["gamma"], prepared["beta"])

    return out2d[:M, :H].reshape(B, S, H)


def _init_params(key, hidden):
    ks = jax.random.split(key, 4)
    scale = 1.0 / jnp.sqrt(hidden)
    return {
        "w1": jax.random.uniform(ks[0], (hidden, hidden), jnp.float32, -scale, scale),
        "b1": jax.random.uniform(ks[1], (hidden,), jnp.float32, -scale, scale),
        "w2": jax.random.uniform(ks[2], (hidden, hidden), jnp.float32, -scale, scale),
        "b2": jax.random.uniform(ks[3], (hidden,), jnp.float32, -scale, scale),
        "gamma": jnp.ones((hidden,), jnp.float32),
        "beta": jnp.zeros((hidden,), jnp.float32),
    }


def _reference(x, params):
    h = jnp.maximum(x @ params["w1"].T + params["b1"], 0.0)
    y = h @ params["w2"].T + params["b2"]
    mean = jnp.mean(y, axis=-1, keepdims=True)
    var = jnp.mean((y - mean) ** 2, axis=-1, keepdims=True)
    return (y - mean) / jnp.sqrt(var + 1e-5) * params["gamma"] + params["beta"]


if __name__ == "__main__":
    key = jax.random.PRNGKey(0)
    k_x, k_p = jax.random.split(key)

    B, S, H = 2, 8, 32
    x = jax.random.normal(k_x, (B, S, H), jnp.float32)
    params = _init_params(k_p, H)

    prepared = prepare_params(params)  # one-time transpose + pad
    out = description_adapter(x, prepared)
    out = jax.block_until_ready(out)

    ref = _reference(x, params)
    assert out.shape == (B, S, H)
    assert jnp.allclose(out, ref, atol=1e-4, rtol=1e-4)

    print("KERNEL_OK")
</pallas_src>

<mosaic_0001>
module attributes {stable_mosaic.version = 11 : i64} {
  func.func @_adapter_kernel(%arg0: i32, %arg1: memref<16x128xf32, #tpu.memory_space<vmem>>, %arg2: memref<128x128xf32, #tpu.memory_space<vmem>>, %arg3: memref<1x128xf32, #tpu.memory_space<vmem>>, %arg4: memref<128x128xf32, #tpu.memory_space<vmem>>, %arg5: memref<1x128xf32, #tpu.memory_space<vmem>>, %arg6: memref<1x128xf32, #tpu.memory_space<vmem>>, %arg7: memref<1x128xf32, #tpu.memory_space<vmem>>, %arg8: memref<16x128xf32, #tpu.memory_space<vmem>>) attributes {dimension_semantics = [#tpu.dimension_semantics<parallel>], iteration_bounds = array<i64: 1>, scalar_prefetch = 0 : i64, scratch_operands = 0 : i64, tpu.core_type = #tpu.core_type<tc>, window_params = [{transform_indices = @transform_0, window_bounds = array<i64: 16, 128>}, {pipeline_mode = #tpu.pipeline_mode<synchronous>, transform_indices = @transform_1, window_bounds = array<i64: 128, 128>}, {pipeline_mode = #tpu.pipeline_mode<synchronous>, transform_indices = @transform_2, window_bounds = array<i64: 1, 128>}, {pipeline_mode = #tpu.pipeline_mode<synchronous>, transform_indices = @transform_3, window_bounds = array<i64: 128, 128>}, {pipeline_mode = #tpu.pipeline_mode<synchronous>, transform_indices = @transform_4, window_bounds = array<i64: 1, 128>}, {pipeline_mode = #tpu.pipeline_mode<synchronous>, transform_indices = @transform_5, window_bounds = array<i64: 1, 128>}, {pipeline_mode = #tpu.pipeline_mode<synchronous>, transform_indices = @transform_6, window_bounds = array<i64: 1, 128>}, {transform_indices = @transform_7, window_bounds = array<i64: 16, 128>}]} {
    %c0 = arith.constant 0 : index
    %c0_0 = arith.constant 0 : index
    %0 = vector.load %arg1[%c0, %c0_0] : memref<16x128xf32, #tpu.memory_space<vmem>>, vector<16x128xf32>
    %c0_1 = arith.constant 0 : index
    %c0_2 = arith.constant 0 : index
    %1 = vector.load %arg2[%c0_1, %c0_2] : memref<128x128xf32, #tpu.memory_space<vmem>>, vector<128x128xf32>
    %cst = arith.constant dense<0.000000e+00> : vector<16x128xf32>
    %2 = tpu.matmul %0, %1, %cst {dimension_numbers = #tpu.dot_dimension_numbers<[1], [0], [0], [1], [0, 0, 1, 1], [], []>} : vector<16x128xf32>, vector<128x128xf32>, vector<16x128xf32> -> vector<16x128xf32>
    %c0_3 = arith.constant 0 : index
    %c0_4 = arith.constant 0 : index
    %3 = vector.load %arg3[%c0_3, %c0_4] : memref<1x128xf32, #tpu.memory_space<vmem>>, vector<1x128xf32>
    %4 = vector.broadcast %3 : vector<1x128xf32> to vector<16x128xf32>
    %5 = arith.addf %2, %4 : vector<16x128xf32>
    %cst_5 = arith.constant 0.000000e+00 : f32
    %6 = vector.broadcast %cst_5 : f32 to vector<16x128xf32>
    %7 = arith.maximumf %5, %6 : vector<16x128xf32>
    %c0_6 = arith.constant 0 : index
    %c0_7 = arith.constant 0 : index
    %8 = vector.load %arg4[%c0_6, %c0_7] : memref<128x128xf32, #tpu.memory_space<vmem>>, vector<128x128xf32>
    %cst_8 = arith.constant dense<0.000000e+00> : vector<16x128xf32>
    %9 = tpu.matmul %7, %8, %cst_8 {dimension_numbers = #tpu.dot_dimension_numbers<[1], [0], [0], [1], [0, 0, 1, 1], [], []>} : vector<16x128xf32>, vector<128x128xf32>, vector<16x128xf32> -> vector<16x128xf32>
    %c0_9 = arith.constant 0 : index
    %c0_10 = arith.constant 0 : index
    %10 = vector.load %arg5[%c0_9, %c0_10] : memref<1x128xf32, #tpu.memory_space<vmem>>, vector<1x128xf32>
    %11 = vector.broadcast %10 : vector<1x128xf32> to vector<16x128xf32>
    %12 = arith.addf %9, %11 : vector<16x128xf32>
    %cst_11 = arith.constant dense<0.000000e+00> : vector<16xf32>
    %13 = vector.multi_reduction <add>, %12, %cst_11 [1] : vector<16x128xf32> to vector<16xf32>
    %14 = vector.shape_cast %13 : vector<16xf32> to vector<16x1xf32>
    %15 = arith.mulf %12, %12 : vector<16x128xf32>
    %cst_12 = arith.constant dense<0.000000e+00> : vector<16xf32>
    %16 = vector.multi_reduction <add>, %15, %cst_12 [1] : vector<16x128xf32> to vector<16xf32>
    %17 = vector.shape_cast %16 : vector<16xf32> to vector<16x1xf32>
    %cst_13 = arith.constant 3.125000e-02 : f32
    %18 = vector.broadcast %cst_13 : f32 to vector<16x1xf32>
    %19 = arith.mulf %14, %18 : vector<16x1xf32>
    %cst_14 = arith.constant 3.125000e-02 : f32
    %20 = vector.broadcast %cst_14 : f32 to vector<16x1xf32>
    %21 = arith.mulf %17, %20 : vector<16x1xf32>
    %22 = arith.mulf %19, %19 : vector<16x1xf32>
    %23 = arith.subf %21, %22 : vector<16x1xf32>
    %24 = vector.broadcast %19 : vector<16x1xf32> to vector<16x128xf32>
    %25 = arith.subf %12, %24 : vector<16x128xf32>
    %cst_15 = arith.constant 9.99999974E-6 : f32
    %26 = vector.broadcast %cst_15 : f32 to vector<16x1xf32>
    %27 = arith.addf %23, %26 : vector<16x1xf32>
    %28 = math.rsqrt %27 : vector<16x1xf32>
    %29 = vector.broadcast %28 : vector<16x1xf32> to vector<16x128xf32>
    %30 = arith.mulf %25, %29 : vector<16x128xf32>
    %c0_16 = arith.constant 0 : index
    %c0_17 = arith.constant 0 : index
    %31 = vector.load %arg6[%c0_16, %c0_17] : memref<1x128xf32, #tpu.memory_space<vmem>>, vector<1x128xf32>
    %32 = vector.broadcast %31 : vector<1x128xf32> to vector<16x128xf32>
    %33 = arith.mulf %30, %32 : vector<16x128xf32>
    %c0_18 = arith.constant 0 : index
    %c0_19 = arith.constant 0 : index
    %34 = vector.load %arg7[%c0_18, %c0_19] : memref<1x128xf32, #tpu.memory_space<vmem>>, vector<1x128xf32>
    %35 = vector.broadcast %34 : vector<1x128xf32> to vector<16x128xf32>
    %36 = arith.addf %33, %35 : vector<16x128xf32>
    %c0_20 = arith.constant 0 : index
    %c0_21 = arith.constant 0 : index
    %37 = vector.load %arg8[%c0_20, %c0_21] : memref<16x128xf32, #tpu.memory_space<vmem>>, vector<16x128xf32>
    tpu.vector_store %arg8[%c0_20, %c0_21], %36 {strides = array<i32>} : memref<16x128xf32, #tpu.memory_space<vmem>>, vector<16x128xf32>,
    return
  }
  func.func @transform_0(%arg0: i32) -> (i32, i32) {
    %c0_i32 = arith.constant 0 : i32
    %c0_i32_0 = arith.constant 0 : i32
    return %arg0, %c0_i32 : i32, i32
  }
  func.func @transform_1(%arg0: i32) -> (i32, i32) {
    %c0_i32 = arith.constant 0 : i32
    %c0_i32_0 = arith.constant 0 : i32
    %c0_i32_1 = arith.constant 0 : i32
    return %c0_i32, %c0_i32_0 : i32, i32
  }
  func.func @transform_2(%arg0: i32) -> (i32, i32) {
    %c0_i32 = arith.constant 0 : i32
    %c0_i32_0 = arith.constant 0 : i32
    %c0_i32_1 = arith.constant 0 : i32
    return %c0_i32, %c0_i32_0 : i32, i32
  }
  func.func @transform_3(%arg0: i32) -> (i32, i32) {
    %c0_i32 = arith.constant 0 : i32
    %c0_i32_0 = arith.constant 0 : i32
    %c0_i32_1 = arith.constant 0 : i32
    return %c0_i32, %c0_i32_0 : i32, i32
  }
  func.func @transform_4(%arg0: i32) -> (i32, i32) {
    %c0_i32 = arith.constant 0 : i32
    %c0_i32_0 = arith.constant 0 : i32
    %c0_i32_1 = arith.constant 0 : i32
    return %c0_i32, %c0_i32_0 : i32, i32
  }
  func.func @transform_5(%arg0: i32) -> (i32, i32) {
    %c0_i32 = arith.constant 0 : i32
    %c0_i32_0 = arith.constant 0 : i32
    %c0_i32_1 = arith.constant 0 : i32
    return %c0_i32, %c0_i32_0 : i32, i32
  }
  func.func @transform_6(%arg0: i32) -> (i32, i32) {
    %c0_i32 = arith.constant 0 : i32
    %c0_i32_0 = arith.constant 0 : i32
    %c0_i32_1 = arith.constant 0 : i32
    return %c0_i32, %c0_i32_0 : i32, i32
  }
  func.func @transform_7(%arg0: i32) -> (i32, i32) {
    %c0_i32 = arith.constant 0 : i32
    %c0_i32_0 = arith.constant 0 : i32
    return %arg0, %c0_i32 : i32, i32
  }
}

</mosaic_0001>

<bundles_post_ra>
// kernel: tpu_custom_call.1
= control target key start
LH: loop header
LB: loop body
LE: loop exit
PB: predicated region body
PF: predicated region fallthrough
CT: control target
= control target key end

     0   :  { %12 = vsyncpa [#allocation3], 0  ;;  %s472_s0 = inlined_call_operand.hbm [shape: f32[16,128], index: 0, kind: input, shape index: {}]   ;;  %s473_s1 = inlined_call_operand.hbm [shape: f32[128,128], index: 1, kind: input, shape index: {}]   ;;  %s474_s2 = inlined_call_operand.vmem [shape: f32[1,128], index: 2, kind: input, shape index: {}]   ;;  %s475_s3 = inlined_call_operand.hbm [shape: f32[128,128], index: 3, kind: input, shape index: {}]   ;;  %s476_s4 = inlined_call_operand.vmem [shape: f32[1,128], index: 4, kind: input, shape index: {}]   ;;  %s477_s5 = inlined_call_operand.vmem [shape: f32[1,128], index: 5, kind: input, shape index: {}]   ;;  %s478_s6 = inlined_call_operand.vmem [shape: f32[1,128], index: 6, kind: input, shape index: {}]   ;;  %s479_s7 = inlined_call_operand.hbm [shape: f32[16,128], index: 7, kind: output, shape index: {}]  }
   0x1   :  { %13 = vsyncpa [#allocation6], 0 }
   0x2   :  { %14 = vsyncpa [#allocation4], 0  ;;  %s32_s26 = sshll.u32 %s473_s1, 4  ;;  %s390_s27 = smov [#allocation5]   ;;  %s33_s26 = int_to_ptr.hbm [resolvable:$true] %s32_s26 }
   0x3   :  { %s34_s28 = sshll.u32 %s390_s27, 4  ;;  %s19_s8 = sshll.u32 %s472_s0, 4  ;;  %s35_s28 = int_to_ptr.vmem [resolvable:$true] %s34_s28  ;;  %s20_s8 = int_to_ptr.hbm [resolvable:$true] %s19_s8 }
   0x4   :  { %s391_s9 = smov 128   ;;  %s392_s10 = smov 8  }
   0x5   :  { %40 = dma.hbm_to_vmem [thread:$0]  %s33_s26, 2048, %s35_s28, [#allocation6], %s391_s9, %s391_s9, %s392_s10  }
   0x6   :  { %s393_s11 = smov [#allocation2]   ;;  %s47_s1 = sshll.u32 %s475_s3, 4  ;;  %s48_s1 = int_to_ptr.hbm [resolvable:$true] %s47_s1 }
   0x7   :  { %s21_s12 = sshll.u32 %s393_s11, 4  ;;  %s394_s0 = smov [#allocation7]   ;;  %s22_s12 = int_to_ptr.vmem [resolvable:$true] %s21_s12 }
   0x8   :  { %27 = dma.hbm_to_vmem [thread:$0]  %s20_s8, 256, %s22_s12, [#allocation3], %s391_s9, %s391_s9, %s392_s10  }
   0x9   :  { %s49_s15 = sshll.u32 %s394_s0, 4  ;;  %s50_s15 = int_to_ptr.vmem [resolvable:$true] %s49_s15 }
   0xa   :  { %55 = dma.hbm_to_vmem [thread:$0]  %s48_s1, 2048, %s50_s15, [#allocation6], %s391_s9, %s391_s9, %s392_s10  }
   0xb   :  { %384 = dma.done.wait [#allocation3], 256  }
   0xc   :  { %385 = vsyncadd [#allocation3], 4294967040 }
   0xd   :  { %386 = dma.done.wait [#allocation6], 4096  }
   0xe   :  { %387 = vsyncadd [#allocation6], 4294963200  ;;  %v91_v0 = vld [vmem:[#allocation5 + $0x78] sm:$0xff]  ;;  %v90_v1 = vld [vmem:[#allocation5 + $0x70] sm:$0xff] }
   0xf   :  { %96 = vmatpush.msra.mxu0 %v91_v0  ;;  %242 = vmatpush.msra.mxu2 %v91_v0  ;;  %v89_v2 = vld [vmem:[#allocation5 + $0x68] sm:$0xff]  ;;  %v88_v3 = vld [vmem:[#allocation5 + $0x60] sm:$0xff]  ;;  %v87_v4 = vld [vmem:[#allocation5 + $0x58] sm:$0xff] }
  0x10   :  { %v136_v5 = vld [vmem:[#allocation7 + $0x78] sm:$0xff]  ;;  %v135_v6 = vld [vmem:[#allocation7 + $0x70] sm:$0xff]  ;;  %v134_v8 = vld [vmem:[#allocation7 + $0x68] sm:$0xff] }
  0x11   :  { %97 = vmatpush.msra.mxu0 %v90_v1  ;;  %243 = vmatpush.msra.mxu2 %v90_v1  ;;  %v86_v7 = vld [vmem:[#allocation5 + $0x50] sm:$0xff]  ;;  %v85_v9 = vld [vmem:[#allocation5 + $0x48] sm:$0xff]  ;;  %v133_v10 = vld [vmem:[#allocation7 + $0x60] sm:$0xff] }
  0x12   :  { %141 = vmatpush.msra.mxu1 %v136_v5  ;;  %258 = vmatpush.msra.mxu3 %v136_v5  ;;  %v84_v11 = vld [vmem:[#allocation5 + $0x40] sm:$0xff]  ;;  %v132_v12 = vld [vmem:[#allocation7 + $0x58] sm:$0xff]  ;;  %v131_v14 = vld [vmem:[#allocation7 + $0x50] sm:$0xff] }
  0x13   :  { %98 = vmatpush.msra.mxu0 %v89_v2  ;;  %244 = vmatpush.msra.mxu2 %v89_v2  ;;  %v83_v13 = vld [vmem:[#allocation5 + $0x38] sm:$0xff]  ;;  %v82_v15 = vld [vmem:[#allocation5 + $0x30] sm:$0xff]  ;;  %v130_v16 = vld [vmem:[#allocation7 + $0x48] sm:$0xff] }
  0x14   :  { %142 = vmatpush.msra.mxu1 %v135_v6  ;;  %259 = vmatpush.msra.mxu3 %v135_v6  ;;  %v81_v17 = vld [vmem:[#allocation5 + $0x28] sm:$0xff]  ;;  %v129_v18 = vld [vmem:[#allocation7 + $0x40] sm:$0xff]  ;;  %v128_v20 = vld [vmem:[#allocation7 + $0x38] sm:$0xff] }
  0x15   :  { %99 = vmatpush.msra.mxu0 %v88_v3  ;;  %245 = vmatpush.msra.mxu2 %v88_v3  ;;  %v80_v19 = vld [vmem:[#allocation5 + $0x20] sm:$0xff]  ;;  %v79_v21 = vld [vmem:[#allocation5 + $0x18] sm:$0xff]  ;;  %v127_v22 = vld [vmem:[#allocation7 + $0x30] sm:$0xff] }
  0x16   :  { %143 = vmatpush.msra.mxu1 %v134_v8  ;;  %260 = vmatpush.msra.mxu3 %v134_v8  ;;  %v78_v23 = vld [vmem:[#allocation5 + $0x10] sm:$0xff]  ;;  %v126_v24 = vld [vmem:[#allocation7 + $0x28] sm:$0xff]  ;;  %v125_v26 = vld [vmem:[#allocation7 + $0x20] sm:$0xff] }
  0x17   :  { %100 = vmatpush.msra.mxu0 %v87_v4  ;;  %246 = vmatpush.msra.mxu2 %v87_v4  ;;  %v77_v25 = vld [vmem:[#allocation5 + $0x8] sm:$0xff]  ;;  %v76_v27 = vld [vmem:[#allocation5] sm:$0xff]  ;;  %v74_v28 = vld [vmem:[#allocation2] sm:$0xff] }
  0x18   :  { %144 = vmatpush.msra.mxu1 %v133_v10  ;;  %261 = vmatpush.msra.mxu3 %v133_v10  ;;  %v75_v29 = vld [vmem:[#allocation2 + $0x8] sm:$0xff]  ;;  %v123_v31 = vld [vmem:[#allocation7 + $0x10] sm:$0xff]  ;;  %v122_v32 = vld [vmem:[#allocation7 + $0x8] sm:$0xff] }
  0x19   :  { %101 = vmatpush.msra.mxu0 %v86_v7  ;;  %247 = vmatpush.msra.mxu2 %v86_v7  ;;  %v124_v30 = vld [vmem:[#allocation7 + $0x18] sm:$0xff]  ;;  %v121_v33 = vld [vmem:[#allocation7] sm:$0xff]  ;;  %v280_v34 = vld [vmem:[%s474_s2] ss:$0 sm:$0xff] }
  0x1a   :  { %145 = vmatpush.msra.mxu1 %v132_v12  ;;  %262 = vmatpush.msra.mxu3 %v132_v12  ;;  %v281_v41 = vld [vmem:[%s476_s4] ss:$0 sm:$0xff] }
  0x1b   :  { %102 = vmatpush.msra.mxu0 %v85_v9  ;;  %248 = vmatpush.msra.mxu2 %v85_v9  ;;  %v282_v5 = vld [vmem:[%s477_s5] ss:$0 sm:$0xff]  ;;  %s395_s5 = smov [#allocation8]  }
  0x1c   :  { %146 = vmatpush.msra.mxu1 %v131_v14  ;;  %263 = vmatpush.msra.mxu3 %v131_v14  ;;  %v283_v9 = vld [vmem:[%s478_s6] ss:$0 sm:$0xff]  ;;  %s226_s21 = sshll.u32 %s395_s5, 4  ;;  %s228_s6 = sshll.u32 %s479_s7, 4  ;;  %s227_s21 = int_to_ptr.vmem [resolvable:$true] %s226_s21  ;;  %s229_s6 = int_to_ptr.hbm [resolvable:$true] %s228_s6 }
  0x1d   :  { %103 = vmatpush.msra.mxu0 %v84_v11  ;;  %249 = vmatpush.msra.mxu2 %v84_v11 }
  0x1e   :  { %147 = vmatpush.msra.mxu1 %v130_v16  ;;  %264 = vmatpush.msra.mxu3 %v130_v16 }
  0x1f   :  { %104 = vmatpush.msra.mxu0 %v83_v13  ;;  %250 = vmatpush.msra.mxu2 %v83_v13 }
  0x20   :  { %148 = vmatpush.msra.mxu1 %v129_v18  ;;  %265 = vmatpush.msra.mxu3 %v129_v18 }
  0x21   :  { %105 = vmatpush.msra.mxu0 %v82_v15  ;;  %251 = vmatpush.msra.mxu2 %v82_v15 }
  0x22   :  { %149 = vmatpush.msra.mxu1 %v128_v20  ;;  %266 = vmatpush.msra.mxu3 %v128_v20 }
  0x23   :  { %106 = vmatpush.msra.mxu0 %v81_v17  ;;  %252 = vmatpush.msra.mxu2 %v81_v17 }
  0x24   :  { %150 = vmatpush.msra.mxu1 %v127_v22  ;;  %267 = vmatpush.msra.mxu3 %v127_v22 }
  0x25   :  { %107 = vmatpush.msra.mxu0 %v80_v19  ;;  %253 = vmatpush.msra.mxu2 %v80_v19 }
  0x26   :  { %151 = vmatpush.msra.mxu1 %v126_v24  ;;  %268 = vmatpush.msra.mxu3 %v126_v24 }
  0x27   :  { %108 = vmatpush.msra.mxu0 %v79_v21  ;;  %254 = vmatpush.msra.mxu2 %v79_v21 }
  0x28   :  { %152 = vmatpush.msra.mxu1 %v125_v26  ;;  %269 = vmatpush.msra.mxu3 %v125_v26 }
  0x29   :  { %109 = vmatpush.msra.mxu0 %v78_v23  ;;  %255 = vmatpush.msra.mxu2 %v78_v23 }
  0x2a   :  { %153 = vmatpush.msra.mxu1 %v124_v30  ;;  %270 = vmatpush.msra.mxu3 %v124_v30 }
  0x2b   :  { %110 = vmatpush.msra.mxu0 %v77_v25  ;;  %256 = vmatpush.msra.mxu2 %v77_v25 }
  0x2c   :  { %154 = vmatpush.msra.mxu1 %v123_v31  ;;  %271 = vmatpush.msra.mxu3 %v123_v31 }
  0x2d   :  { %111 = vmatpush.msra.mxu0 %v76_v27  ;;  %257 = vmatpush.msra.mxu2 %v76_v27 }
  0x2e   :  { %112 = vmatmul.f32.vlgmr.msra.gmra.mxu0 %v74_v28  ;;  %115 = vmatmul.f32.vlgmr.msra.gmra.mxu2 %v75_v29 }
  0x2f   :  { %155 = vmatpush.msra.mxu1 %v122_v32  ;;  %272 = vmatpush.msra.mxu3 %v122_v32 }
  0x31   :  { %156 = vmatpush.msra.mxu1 %v121_v33  ;;  %273 = vmatpush.msra.mxu3 %v121_v33 }
  0xab   :  { %v113_v35 = vpop.f32.mrf.mxu0 }
  0xac   :  { %v114_v36 = vadd.f32 %v280_v34, %v113_v35 }
  0xae   :  { %v119_v37 = vmax.f32 %v114_v36, 0.0 }
  0xb0   :  { %157 = vmatmul.f32.vlgmr.msra.gmra.mxu1 %v119_v37 }
  0xb1   :  { %v116_v38 = vpop.f32.mrf.mxu2 }
  0xb2   :  { %v117_v39 = vadd.f32 %v280_v34, %v116_v38 }
  0xb4   :  { %v120_v40 = vmax.f32 %v117_v39, 0.0 }
  0xb6   :  { %160 = vmatmul.f32.vlgmr.msra.gmra.mxu3 %v120_v40 }
 0x12d   :  { %v158_v42 = vpop.f32.mrf.mxu1 }
 0x12e   :  { %v159_v43 = vadd.f32 %v281_v41, %v158_v42 }
 0x130   :  { %164 = vadd.xlane.f32.xlu0 %v159_v43  ;;  %v168_v44 = vmul.f32 %v159_v43, %v159_v43 }
 0x132   :  { %170 = vadd.xlane.f32.xlu1 %v168_v44 }
 0x139   :  { %v161_v45 = vpop.f32.mrf.mxu3 }
 0x13a   :  { %v162_v46 = vadd.f32 %v281_v41, %v161_v45 }
 0x13c   :  { %166 = vadd.xlane.f32.xlu0 %v162_v46  ;;  %v169_v47 = vmul.f32 %v162_v46, %v162_v46 }
 0x13e   :  { %172 = vadd.xlane.f32.xlu1 %v169_v47 }
 0x1a3   :  { %v165_v48 = vpop.xlane.xlu0 %164 }
 0x1a4   :  { %v174_v49 = vmul.f32 0.03125, %v165_v48 }
 0x1a5   :  { %v171_v50 = vpop.xlane.xlu1 %170 }
 0x1a6   :  { %v178_v51 = vmul.f32 %v174_v49, %v174_v49  ;;  %v176_v52 = vmul.f32 0.03125, %v171_v50  ;;  %v182_v4 = vsub.f32 %v159_v43, %v174_v49 }
 0x1a8   :  { %v180_v53 = vsub.f32 %v176_v52, %v178_v51 }
 0x1aa   :  { %v184_v54 = vadd.f32 1e-05, %v180_v53 }
 0x1ac   :  { %284 = vrsqrt.f32 %v184_v54  ;;  %vm192_vm1 = vweird.f32 %v184_v54 }
 0x1af   :  { %v167_v55 = vpop.xlane.xlu0 %166 }
 0x1b0   :  { %v175_v56 = vmul.f32 0.03125, %v167_v55 }
 0x1b1   :  { %v173_v57 = vpop.xlane.xlu1 %172 }
 0x1b2   :  { %v285_v58 = vpop.eup %284  ;;  %v179_v59 = vmul.f32 %v175_v56, %v175_v56  ;;  %v177_v60 = vmul.f32 0.03125, %v173_v57  ;;  %v183_v17 = vsub.f32 %v162_v46, %v175_v56 }
 0x1b3   :  { %v187_v61 = vmul.f32 %v285_v58, %v184_v54  ;;  %vm193_vm0 = vweird.f32 %v285_v58 }
 0x1b4   :  { %v181_v62 = vsub.f32 %v177_v60, %v179_v59  ;;  %vm194_vm2 = vmor %vm192_vm1, %vm193_vm0 }
 0x1b5   :  { %v188_v63 = vmul.f32 %v285_v58, %v187_v61 }
 0x1b6   :  { %v185_v0 = vadd.f32 1e-05, %v181_v62 }
 0x1b7   :  { %v189_v1 = vmul.f32 0.5, %v188_v63 }
 0x1b8   :  { %286 = vrsqrt.f32 %v185_v0  ;;  %vm202_vm4 = vweird.f32 %v185_v0 }
 0x1b9   :  { %v190_v2 = vsub.f32 1.5, %v189_v1 }
 0x1bb   :  { %v191_v3 = vmul.f32 %v285_v58, %v190_v2 }
 0x1bd   :  { %v195_v6 = vsel %vm194_vm2, %v285_v58, %v191_v3 }
 0x1be   :  { %v287_v7 = vpop.eup %286  ;;  %v206_v8 = vmul.f32 %v195_v6, %v182_v4 }
 0x1bf   :  { %v197_v10 = vmul.f32 %v287_v7, %v185_v0  ;;  %vm203_vm3 = vweird.f32 %v287_v7 }
 0x1c0   :  { %v212_v11 = vmul.f32 %v282_v5, %v206_v8  ;;  %vm204_vm5 = vmor %vm202_vm4, %vm203_vm3 }
 0x1c1   :  { %v198_v12 = vmul.f32 %v287_v7, %v197_v10 }
 0x1c2   :  { %v218_v13 = vadd.f32 %v283_v9, %v212_v11 }
 0x1c3   :  { %v199_v14 = vmul.f32 0.5, %v198_v12 }
 0x1c4   :  { %220 = vst [vmem:[#allocation8] sm:$0xff] %v218_v13 }
 0x1c5   :  { %v200_v15 = vsub.f32 1.5, %v199_v14 }
 0x1c7   :  { %v201_v16 = vmul.f32 %v287_v7, %v200_v15 }
 0x1c9   :  { %v205_v18 = vsel %vm204_vm5, %v287_v7, %v201_v16 }
 0x1ca   :  { %v207_v19 = vmul.f32 %v205_v18, %v183_v17 }
 0x1cc   :  { %v213_v20 = vmul.f32 %v282_v5, %v207_v19 }
 0x1ce   :  { %v219_v21 = vadd.f32 %v283_v9, %v213_v20 }
 0x1d0   :  { %221 = vst [vmem:[#allocation8 + $0x8] sm:$0xff] %v219_v21 }
 0x1d1   :  { %234 = dma.vmem_to_hbm [thread:$0]  %s227_s21, 256, %s229_s6, [#allocation4], %s391_s9, %s391_s9, %s392_s10  }
 0x1d2   :  { %388 = dma.done.wait [#allocation4], 256  }
 0x1d3   :  { %389 = vsyncadd [#allocation4], 4294967040 }
 0x1d4   :  { %239 = vsyncpa [#allocation3], 1 }
 0x1d5   :  { %240 = vsyncpa [#allocation6], 1 }
 0x1d6   :  { %241 = vsyncpa [#allocation4], 1 }

</bundles_post_ra>
